<compile_context>
chip_gen: v6e
topology: v6e:2x2x1
jax: 0.10.0
libtpu: 0.0.40
codegen_flags: <defaults>
</compile_context>

<pallas_src>
import functools

import jax
import jax.numpy as jnp
from jax.experimental import pallas as pl
from jax.experimental.pallas import tpu as pltpu


def _sobel3x3_kernel(x_ref, o_ref, *, h, w):
    """x_ref / o_ref: VMEM (nb, h*w) -- each image flattened along the lane axis."""
    hw = h * w
    x = x_ref[...].astype(jnp.float32)

    col = jax.lax.broadcasted_iota(jnp.int32, x.shape, 1)   # lane position in packed row
    lane = col % w                                           # column inside one image row

    # Horizontal [1, 0, -1] tap.  Zero padding: the lane roll wraps at row
    # boundaries, so mask the first / last column of every image row to zero.
    left = jnp.where(lane == 0, 0.0, pltpu.roll(x, 1, axis=1))
    right = jnp.where(lane == w - 1, 0.0, pltpu.roll(x, hw - 1, axis=1))
    d = left - right                       # d[i, j] = x[i, j-1] - x[i, j+1] (zero-padded)

    # Vertical [1, 2, 1] accumulation.  Adjacent image rows are exactly w lanes
    # apart in the packed layout, so +-1-row shifts are lane rolls by +-w;
    # mask the top / bottom rows (zero padding).
    up = jnp.where(col < w, 0.0, pltpu.roll(d, w, axis=1))
    down = jnp.where(col >= (h - 1) * w, 0.0, pltpu.roll(d, hw - w, axis=1))

    o_ref[...] = (up + 2.0 * d + down).astype(o_ref.dtype)


def _pick_batch_block(n, row_bytes, target_bytes=4 << 20, min_step_bytes=256 << 10):
    """Images per grid step: ~target_bytes of input per step, a sublane multiple
    (8) whenever the block does not span the full batch, and >=2 grid steps when
    each step still moves >= min_step_bytes (keeps both v7x TensorCores fed
    without shrinking tiles into per-step-overhead territory on v5e / v6e)."""
    nb = max(1, min(n, target_bytes // max(row_bytes, 1)))
    if nb == n and n >= 2 and (n * row_bytes) // 2 >= min_step_bytes:
        nb = -(-n // 2)                    # ceil(n / 2): two grid steps
    if nb < n and nb % 8 != 0:             # partial-batch block: keep (8,128) tiling
        nb = (nb - nb % 8) if nb > 8 else min(n, 8)
    return max(1, min(nb, n))


def sobel(x, *, batch_block=None):
    """Fixed Sobel-x 3x3 conv, stride 1, zero padding 1 (Conv2d(1, 1, 3, 1, 1), no bias).

    x: (N, 1, H, W).  Returns (N, 1, H, W) in the input dtype; compute is f32.
    """
    N, C, H, W = x.shape
    assert C == 1, "edge-filter path is Conv2d(1, 1, ...)"
    HW = H * W
    itemsize = jnp.dtype(x.dtype).itemsize

    # Lane-dense packing: fold H into the lane axis (contiguous, free reshape).
    x_flat = x.reshape(N, HW)

    nb = batch_block if batch_block is not None else _pick_batch_block(N, HW * itemsize)
    nb = max(1, min(nb, N))
    grid = (pl.cdiv(N, nb),)

    # Per-step footprint ~= double-buffered input + output tiles (+ f32 vregs).
    tile_bytes = nb * HW * max(itemsize, 4)
    vmem_limit = int(min(64 << 20, max(16 << 20, 6 * tile_bytes)))

    kernel = functools.partial(_sobel3x3_kernel, h=H, w=W)
    out = pl.pallas_call(
        kernel,
        out_shape=jax.ShapeDtypeStruct((N, HW), x.dtype),
        grid_spec=pltpu.PrefetchScalarGridSpec(
            num_scalar_prefetch=0,
            grid=grid,
            in_specs=[pl.BlockSpec((nb, HW), lambda n: (n, 0))],
            out_specs=pl.BlockSpec((nb, HW), lambda n: (n, 0)),
        ),
        compiler_params=pltpu.CompilerParams(
            dimension_semantics=("parallel",),
            vmem_limit_bytes=vmem_limit,
        ),
        cost_estimate=pl.CostEstimate(
            flops=9 * N * HW,
            transcendentals=0,
            bytes_accessed=2 * N * HW * itemsize,
        ),
    )(x_flat)

    return out.reshape(N, 1, H, W)


def sobel_reference(x):
    """Pure-JAX reference (same semantics as F.conv2d with padding=1, fixed weight)."""
    N, C, H, W = x.shape
    w = jnp.array([[1.0, 0.0, -1.0],
                   [2.0, 0.0, -2.0],
                   [1.0, 0.0, -1.0]], dtype=jnp.float32)
    xp = jnp.pad(x[:, 0].astype(jnp.float32), ((0, 0), (1, 1), (1, 1)))
    acc = jnp.zeros((N, H, W), jnp.float32)
    for di in range(3):
        for dj in range(3):
            acc = acc + w[di, dj] * xp[:, di:di + H, dj:dj + W]
    return acc[:, None].astype(x.dtype)


if __name__ == "__main__":
    key = jax.random.PRNGKey(0)

    # Primary shape: single-channel edge-filter conv path.
    x = jax.random.normal(key, (2, 1, 16, 16), dtype=jnp.float32)
    y = jax.block_until_ready(sobel(x))
    assert y.shape == (2, 1, 16, 16)
    assert jnp.allclose(y, sobel_reference(x), atol=1e-5, rtol=1e-5)

    # Multi-step grid path (2 grid steps of 8 images each; exercises the
    # batch-blocked index_map and parallel grid sharding).
    x_big = jax.random.normal(jax.random.PRNGKey(1), (16, 1, 16, 16), dtype=jnp.float32)
    y_big = jax.block_until_ready(sobel(x_big, batch_block=8))
    assert jnp.allclose(y_big, sobel_reference(x_big), atol=1e-5, rtol=1e-5)

    print("KERNEL_OK")
</pallas_src>

<mosaic_0001>
module attributes {stable_mosaic.version = 11 : i64} {
  func.func @_sobel3x3_kernel(%arg0: i32, %arg1: memref<2x256xf32, #tpu.memory_space<vmem>>, %arg2: memref<2x256xf32, #tpu.memory_space<vmem>>) attributes {dimension_semantics = [#tpu.dimension_semantics<parallel>], iteration_bounds = array<i64: 1>, scalar_prefetch = 0 : i64, scratch_operands = 0 : i64, tpu.core_type = #tpu.core_type<tc>, window_params = [{transform_indices = @transform_0, window_bounds = array<i64: 2, 256>}, {transform_indices = @transform_1, window_bounds = array<i64: 2, 256>}]} {
    %c0 = arith.constant 0 : index
    %c0_0 = arith.constant 0 : index
    %0 = vector.load %arg1[%c0, %c0_0] : memref<2x256xf32, #tpu.memory_space<vmem>>, vector<2x256xf32>
    %1 = tpu.iota {dimensions = array<i32: 1>} : vector<2x256xi32>
    %c16_i32 = arith.constant 16 : i32
    %c0_i32 = arith.constant 0 : i32
    %2 = arith.cmpi eq, %c16_i32, %c0_i32 : i32
    %c1_i32 = arith.constant 1 : i32
    %3 = arith.select %2, %c1_i32, %c16_i32 : i32
    %4 = vector.broadcast %3 : i32 to vector<2x256xi32>
    %5 = arith.remsi %1, %4 : vector<2x256xi32>
    %c0_i32_1 = arith.constant 0 : i32
    %6 = vector.broadcast %c0_i32_1 : i32 to vector<2x256xi32>
    %7 = arith.cmpi ne, %5, %6 : vector<2x256xi32>
    %c0_i32_2 = arith.constant 0 : i32
    %8 = vector.broadcast %c0_i32_2 : i32 to vector<2x256xi32>
    %9 = arith.cmpi slt, %5, %8 : vector<2x256xi32>
    %c0_i32_3 = arith.constant 0 : i32
    %10 = arith.cmpi slt, %3, %c0_i32_3 : i32
    %11 = vector.broadcast %10 : i1 to vector<2x256xi1>
    %12 = vector.broadcast %11 : vector<2x256xi1> to vector<2x256xi1>
    %13 = arith.xori %9, %12 : vector<2x256xi1>
    %14 = arith.andi %13, %7 : vector<2x256xi1>
    %15 = vector.broadcast %3 : i32 to vector<2x256xi32>
    %16 = arith.addi %5, %15 : vector<2x256xi32>
    %17 = arith.select %14, %16, %5 : vector<2x256xi1>, vector<2x256xi32>
    %c0_i32_4 = arith.constant 0 : i32
    %18 = vector.broadcast %c0_i32_4 : i32 to vector<2x256xi32>
    %19 = arith.cmpi eq, %17, %18 : vector<2x256xi32>
    %c1_i32_5 = arith.constant 1 : i32
    %20 = tpu.dynamic_rotate %0 by %c1_i32_5 dim 1 : vector<2x256xf32>, i32 -> vector<2x256xf32>
    %cst = arith.constant 0.000000e+00 : f32
    %21 = vector.broadcast %cst : f32 to vector<2x256xf32>
    %22 = arith.select %19, %21, %20 : vector<2x256xi1>, vector<2x256xf32>
    %c15_i32 = arith.constant 15 : i32
    %23 = vector.broadcast %c15_i32 : i32 to vector<2x256xi32>
    %24 = arith.cmpi eq, %17, %23 : vector<2x256xi32>
    %c255_i32 = arith.constant 255 : i32
    %25 = tpu.dynamic_rotate %0 by %c255_i32 dim 1 : vector<2x256xf32>, i32 -> vector<2x256xf32>
    %cst_6 = arith.constant 0.000000e+00 : f32
    %26 = vector.broadcast %cst_6 : f32 to vector<2x256xf32>
    %27 = arith.select %24, %26, %25 : vector<2x256xi1>, vector<2x256xf32>
    %28 = arith.subf %22, %27 : vector<2x256xf32>
    %c16_i32_7 = arith.constant 16 : i32
    %29 = vector.broadcast %c16_i32_7 : i32 to vector<2x256xi32>
    %30 = arith.cmpi slt, %1, %29 : vector<2x256xi32>
    %c16_i32_8 = arith.constant 16 : i32
    %31 = tpu.dynamic_rotate %28 by %c16_i32_8 dim 1 : vector<2x256xf32>, i32 -> vector<2x256xf32>
    %cst_9 = arith.constant 0.000000e+00 : f32
    %32 = vector.broadcast %cst_9 : f32 to vector<2x256xf32>
    %33 = arith.select %30, %32, %31 : vector<2x256xi1>, vector<2x256xf32>
    %c240_i32 = arith.constant 240 : i32
    %34 = vector.broadcast %c240_i32 : i32 to vector<2x256xi32>
    %35 = arith.cmpi sge, %1, %34 : vector<2x256xi32>
    %c240_i32_10 = arith.constant 240 : i32
    %36 = tpu.dynamic_rotate %28 by %c240_i32_10 dim 1 : vector<2x256xf32>, i32 -> vector<2x256xf32>
    %cst_11 = arith.constant 0.000000e+00 : f32
    %37 = vector.broadcast %cst_11 : f32 to vector<2x256xf32>
    %38 = arith.select %35, %37, %36 : vector<2x256xi1>, vector<2x256xf32>
    %cst_12 = arith.constant 2.000000e+00 : f32
    %39 = vector.broadcast %cst_12 : f32 to vector<2x256xf32>
    %40 = arith.mulf %39, %28 : vector<2x256xf32>
    %41 = arith.addf %33, %40 : vector<2x256xf32>
    %42 = arith.addf %41, %38 : vector<2x256xf32>
    %c0_13 = arith.constant 0 : index
    %c0_14 = arith.constant 0 : index
    %43 = vector.load %arg2[%c0_13, %c0_14] : memref<2x256xf32, #tpu.memory_space<vmem>>, vector<2x256xf32>
    tpu.vector_store %arg2[%c0_13, %c0_14], %42 {strides = array<i32>} : memref<2x256xf32, #tpu.memory_space<vmem>>, vector<2x256xf32>,
    return
  }
  func.func @transform_0(%arg0: i32) -> (i32, i32) {
    %c0_i32 = arith.constant 0 : i32
    %c0_i32_0 = arith.constant 0 : i32
    return %arg0, %c0_i32 : i32, i32
  }
  func.func @transform_1(%arg0: i32) -> (i32, i32) {
    %c0_i32 = arith.constant 0 : i32
    %c0_i32_0 = arith.constant 0 : i32
    return %arg0, %c0_i32 : i32, i32
  }
}

</mosaic_0001>

<bundles_post_ra>
// kernel: tpu_custom_call.1
= control target key start
LH: loop header
LB: loop body
LE: loop exit
PB: predicated region body
PF: predicated region fallthrough
CT: control target
= control target key end

     0   :  { %6 = vsyncpa [#allocation3], 0  ;;  %s212_s0 = inlined_call_operand.hbm [shape: f32[2,256], index: 0, kind: input, shape index: {}]   ;;  %s213_s1 = inlined_call_operand.hbm [shape: f32[2,256], index: 1, kind: output, shape index: {}]  }
   0x1   :  { %7 = vsyncpa [#allocation4], 0  ;;  %s190_s6 = smov [#allocation2]  }
   0x2   :  { %s14_s7 = sshll.u32 %s190_s6, 4  ;;  %s15_s7 = int_to_ptr.vmem [resolvable:$true] %s14_s7 }
   0x3   :  { %s154_s8 = scalar_lea.vmem %s15_s7, 64  ;;  %p159_p1 = scmp.lt.s32.totalorder %s15_s7, %s15_s7 }
   0x4   :  { %p155_p0 = scmp.ne.s32.totalorder %s15_s7, %s154_s8  ;;  %p160_p2 = scmp.lt.s32.totalorder %s154_s8, %s154_s8 }
   0x6   :  { %p161_p3 = por %p160_p2, %p159_p1 }
   0x8   :  { %p162_p4 = pnand %p161_p3, %p155_p0 }
   0xa   :  { %165 = shalt.err (!%p162_p4)
}
   0xb   :  { %17 = dma.hbm_to_vmem [thread:$0]  %s212_s0, 64, %s15_s7, [#allocation3]  }
   0xc   :  { %186 = dma.done.wait [#allocation3], 64  }
   0xd   :  { %187 = vsyncadd [#allocation3], 4294967232  ;;  %v138_v0 = vld.sshfl [vmem:[#allocation2] sm:$0x33 pattern:$0x76325410]  ;;  %v22_v2 = vlaneseq }
   0xe   :  { %s191_s11 = smov 127   ;;  %s192_s12 = smov 1   ;;  %v59_v1 = vcombine.high %v138_v0, %v138_v0 }
   0xf   :  { %73 = vrot.lane.b32.xlu1 %v138_v0, %s191_s11  ;;  %62 = vrot.lane.b32.xlu0 %v138_v0, %s192_s12  ;;  %v23_v3 = vand.u32 127, %v22_v2  ;;  %s193_s0 = smov 16   ;;  %s194_s13 = smov 112  }
  0x10   :  { %s195_s14 = smov [#allocation5]  }
  0x11   :  { %v24_v4 = vadd.s32 128, %v23_v3  ;;  %v29_v5 = vand.u32 15, %v23_v3  ;;  %vm77_vm0 = vcmp.lt.s32.totalorder %v23_v3, 127  ;;  %vm66_vm1 = vcmp.lt.s32.totalorder %v23_v3, 1  ;;  %s129_s15 = sshll.u32 %s195_s14, 4  ;;  %s130_s15 = int_to_ptr.vmem [resolvable:$true] %s129_s15 }
  0x12   :  { %vm84_vm6 = vcmp.lt.s32.totalorder %v23_v3, 16  ;;  %vm100_vm7 = vcmp.lt.s32.totalorder %v23_v3, 112  ;;  %s166_s16 = scalar_lea.vmem %s130_s15, 64  ;;  %p171_p6 = scmp.lt.s32.totalorder %s130_s15, %s130_s15 }
  0x13   :  { %75 = vrot.lane.b32.xlu1 %v59_v1, %s191_s11  ;;  %64 = vrot.lane.b32.xlu0 %v59_v1, %s192_s12  ;;  %v36_v6 = vand.u32 15, %v24_v4  ;;  %vm71_vm2 = vcmp.eq.s32.totalorder %v29_v5, 15  ;;  %vm49_vm4 = vcmp.eq.s32.totalorder %v29_v5, 0  ;;  %vm95_vm8 = vcmp.ge.s32.totalorder %v24_v4, 240  ;;  %p167_p5 = scmp.ne.s32.totalorder %s130_s15, %s166_s16  ;;  %p172_p7 = scmp.lt.s32.totalorder %s166_s16, %s166_s16 }
  0x15   :  { %vm72_vm3 = vcmp.eq.s32.totalorder %v36_v6, 15  ;;  %vm50_vm5 = vcmp.eq.s32.totalorder %v36_v6, 0  ;;  %p173_p8 = por %p172_p7, %p171_p6 }
  0x17   :  { %p174_p9 = pnand %p173_p8, %p167_p5 }
  0x81   :  { %v74_v7 = vpop.permute.xlu1 %73  ;;  %v63_v8 = vpop.permute.xlu0 %62 }
  0x85   :  { %v76_v9 = vpop.permute.xlu1 %75  ;;  %v65_v10 = vpop.permute.xlu0 %64 }
  0x86   :  { %v78_v11 = vsel %vm77_vm0, %v74_v7, %v76_v9  ;;  %v79_v12 = vsel %vm77_vm0, %v76_v9, %v74_v7  ;;  %v67_v13 = vsel %vm66_vm1, %v63_v8, %v65_v10  ;;  %v68_v14 = vsel %vm66_vm1, %v65_v10, %v63_v8 }
  0x87   :  { %v80_v15 = vsel %vm71_vm2, 0.0, %v78_v11  ;;  %v81_v16 = vsel %vm72_vm3, 0.0, %v79_v12  ;;  %v69_v17 = vsel %vm49_vm4, 0.0, %v68_v14  ;;  %v70_v18 = vsel %vm50_vm5, 0.0, %v67_v13 }
  0x88   :  { %v82_v19 = vsub.f32 %v69_v17, %v80_v15  ;;  %v83_v20 = vsub.f32 %v70_v18, %v81_v16 }
  0x8a   :  { %86 = vrot.lane.b32.xlu0 %v82_v19, %s193_s0  ;;  %88 = vrot.lane.b32.xlu1 %v83_v20, %s193_s0  ;;  %v105_v23 = vmul.f32 2.0, %v82_v19  ;;  %v106_v27 = vmul.f32 2.0, %v83_v20 }
  0x8e   :  { %96 = vrot.lane.b32.xlu0 %v82_v19, %s194_s13  ;;  %98 = vrot.lane.b32.xlu1 %v83_v20, %s194_s13 }
  0xfc   :  { %v87_v21 = vpop.permute.xlu0 %86  ;;  %v89_v22 = vpop.permute.xlu1 %88 }
  0xfd   :  { %v91_v24 = vsel %vm84_vm6, %v89_v22, %v87_v21  ;;  %v90_v25 = vsel %vm84_vm6, %v87_v21, %v89_v22 }
  0xfe   :  { %v92_v26 = vsel %vm84_vm6, 0.0, %v91_v24  ;;  %v108_v31 = vadd.f32 %v106_v27, %v90_v25 }
  0xff   :  { %v107_v28 = vadd.f32 %v105_v23, %v92_v26 }
 0x100   :  { %v97_v29 = vpop.permute.xlu0 %96  ;;  %v99_v30 = vpop.permute.xlu1 %98 }
 0x101   :  { %v101_v32 = vsel %vm100_vm7, %v97_v29, %v99_v30  ;;  %v102_v33 = vsel %vm100_vm7, %v99_v30, %v97_v29 }
 0x102   :  { %v104_v34 = vsel %vm95_vm8, 0.0, %v102_v33  ;;  %v109_v35 = vadd.f32 %v107_v28, %v101_v32 }
 0x103   :  { %v110_v36 = vadd.f32 %v108_v31, %v104_v34 }
 0x105   :  { %v113_v37 = vcombine.low %v109_v35, %v110_v36 }
 0x107   :  { %139 = vst.sshfl [vmem:[#allocation5] sm:$0x33 pattern:$0x76325410] %v113_v37 }
 0x108   :  { %177 = shalt.err (!%p174_p9)
}
 0x109   :  { %132 = dma.vmem_to_hbm [thread:$0]  %s130_s15, 64, %s213_s1, [#allocation4]  }
 0x10a   :  { %188 = dma.done.wait [#allocation4], 64  }
 0x10b   :  { %189 = vsyncadd [#allocation4], 4294967232 }
 0x10c   :  { %136 = vsyncpa [#allocation3], 1 }
 0x10d   :  { %137 = vsyncpa [#allocation4], 1 }

</bundles_post_ra>
